<compile_context>
chip_gen: v7x
topology: tpu7x:2x2x1
jax: 0.10.0
libtpu: 0.0.40
codegen_flags: <defaults>
</compile_context>

<pallas_src>
import functools

import jax
import jax.numpy as jnp
from jax.experimental import pallas as pl
from jax.experimental.pallas import tpu as pltpu

EPS = 1e-5
VMEM_LIMIT = 48 * 1024 * 1024  # safe on v5e/v6e (128 MiB) and v7x (64 MiB physical)


# -----------------------------------------------------------------------------
# Pallas kernels
# -----------------------------------------------------------------------------
def _matmul_bias_kernel(a_ref, b_ref, shift_ref, o_ref, *, relu):
    """o = relu?( (a @ b) + shift ); a cast to bf16 in-register, f32 accumulation."""
    a = a_ref[...].astype(jnp.bfloat16)
    acc = jnp.dot(a, b_ref[...], preferred_element_type=jnp.float32)
    y = acc + shift_ref[...]
    if relu:
        y = jnp.maximum(y, 0.0)
    o_ref[...] = y.astype(o_ref.dtype)


def _matmul_bias_res_kernel(a_ref, b_ref, shift_ref, res_ref, o_ref, *, relu):
    """o = relu?( (a @ b) + shift + residual ) — fused bottleneck tail."""
    a = a_ref[...].astype(jnp.bfloat16)
    acc = jnp.dot(a, b_ref[...], preferred_element_type=jnp.float32)
    y = acc + shift_ref[...] + res_ref[...]
    if relu:
        y = jnp.maximum(y, 0.0)
    o_ref[...] = y.astype(o_ref.dtype)


def _max_over_taps_kernel(x_ref, o_ref):
    # x: [9, tm, C] -> max over the 9 taps (3x3 max-pool reduction)
    o_ref[...] = jnp.max(x_ref[...], axis=0)


def _spatial_mean_kernel(x_ref, o_ref):
    # x: [1, HW, C] -> mean over HW (adaptive avg pool to 1x1)
    o_ref[...] = jnp.mean(x_ref[...], axis=1, keepdims=True)


# -----------------------------------------------------------------------------
# Pallas wrappers
# -----------------------------------------------------------------------------
def matmul_bias_act(a, b, shift, residual=None, relu=True):
    """a:[M,K] (f32 or bf16) @ b:[K,N] (bf16) + shift:[1,N] (+ residual:[M,N]) -> f32.

    Full-K single block contraction (no k grid axis, no K padding), ragged M blocks,
    lane-dense N tiles (full-dim block when N is not 128-aligned).
    """
    M, K = a.shape
    Kb, N = b.shape
    assert K == Kb

    tm = M if M <= 256 else 256
    if N <= 256:
        tn = N
    elif N % 256 == 0:
        tn = 256
    elif N % 128 == 0:
        tn = 128
    else:
        raise ValueError(f"unsupported N={N}")

    grid = (pl.cdiv(M, tm), N // tn)

    in_specs = [
        pl.BlockSpec((tm, K), lambda i, j: (i, 0)),
        pl.BlockSpec((K, tn), lambda i, j: (0, j)),
        pl.BlockSpec((1, tn), lambda i, j: (0, j)),
    ]
    args = [a, b, shift]
    if residual is not None:
        in_specs.append(pl.BlockSpec((tm, tn), lambda i, j: (i, j)))
        args.append(residual)
        kernel = functools.partial(_matmul_bias_res_kernel, relu=relu)
    else:
        kernel = functools.partial(_matmul_bias_kernel, relu=relu)

    return pl.pallas_call(
        kernel,
        out_shape=jax.ShapeDtypeStruct((M, N), jnp.float32),
        grid_spec=pltpu.PrefetchScalarGridSpec(
            num_scalar_prefetch=0,
            grid=grid,
            in_specs=in_specs,
            out_specs=pl.BlockSpec((tm, tn), lambda i, j: (i, j)),
        ),
        compiler_params=pltpu.CompilerParams(
            dimension_semantics=("parallel", "parallel"),
            vmem_limit_bytes=VMEM_LIMIT,
        ),
    )(*args)


def conv_block(x, w, shift, stride, relu, residual=None):
    """x: NHWC f32, w: [KH,KW,Cin,Cout] bf16 (BN scale folded in), shift: [1,Cout] f32.

    1x1 convs feed the f32 feature map directly (cast to bf16 inside the kernel);
    KxK convs build im2col patches already in bf16.  Optional residual is fused
    into the matmul epilogue (add + ReLU).
    """
    KH, KW, Cin, Cout = w.shape
    N, H, W, _ = x.shape
    pad = (KH - 1) // 2
    OH = (H + 2 * pad - KH) // stride + 1
    OW = (W + 2 * pad - KW) // stride + 1
    M = N * OH * OW

    if KH == 1 and KW == 1:
        xs = x[:, ::stride, ::stride, :] if stride > 1 else x
        a = xs.reshape(M, Cin)                       # f32; cast in-kernel
    else:
        xb = x.astype(jnp.bfloat16)                  # halve im2col bytes
        xp = jnp.pad(xb, ((0, 0), (pad, pad), (pad, pad), (0, 0)))
        cols = [
            xp[:, kh:kh + stride * OH:stride, kw:kw + stride * OW:stride, :]
            for kh in range(KH)
            for kw in range(KW)
        ]
        a = jnp.concatenate(cols, axis=-1).reshape(M, KH * KW * Cin)

    wm = w.reshape(KH * KW * Cin, Cout)
    res = None if residual is None else residual.reshape(M, Cout)
    out = matmul_bias_act(a, wm, shift, residual=res, relu=relu)
    return out.reshape(N, OH, OW, Cout)


def maxpool_3x3_s2(x):
    N, H, W, C = x.shape
    OH = (H + 2 - 3) // 2 + 1
    OW = (W + 2 - 3) // 2 + 1
    M = N * OH * OW
    xp = jnp.pad(x, ((0, 0), (1, 1), (1, 1), (0, 0)), constant_values=-jnp.inf)
    taps = [
        xp[:, kh:kh + 2 * OH:2, kw:kw + 2 * OW:2, :]
        for kh in range(3)
        for kw in range(3)
    ]
    patches = jnp.stack(taps, axis=0).reshape(9, M, C)

    tm = M if M <= 512 else 512
    out = pl.pallas_call(
        _max_over_taps_kernel,
        out_shape=jax.ShapeDtypeStruct((M, C), jnp.float32),
        grid_spec=pltpu.PrefetchScalarGridSpec(
            num_scalar_prefetch=0,
            grid=(pl.cdiv(M, tm),),
            in_specs=[pl.BlockSpec((9, tm, C), lambda i: (0, i, 0))],
            out_specs=pl.BlockSpec((tm, C), lambda i: (i, 0)),
        ),
        compiler_params=pltpu.CompilerParams(
            dimension_semantics=("arbitrary",),
            vmem_limit_bytes=VMEM_LIMIT,
        ),
    )(patches)
    return out.reshape(N, OH, OW, C)


def global_avgpool(x):
    N, H, W, C = x.shape
    HW = H * W
    x3 = x.reshape(N, HW, C)
    out = pl.pallas_call(
        _spatial_mean_kernel,
        out_shape=jax.ShapeDtypeStruct((N, 1, C), jnp.float32),
        grid_spec=pltpu.PrefetchScalarGridSpec(
            num_scalar_prefetch=0,
            grid=(N,),
            in_specs=[pl.BlockSpec((1, HW, C), lambda i: (i, 0, 0))],
            out_specs=pl.BlockSpec((1, 1, C), lambda i: (i, 0, 0)),
        ),
        compiler_params=pltpu.CompilerParams(
            dimension_semantics=("arbitrary",),
            vmem_limit_bytes=VMEM_LIMIT,
        ),
    )(x3)
    return out.reshape(N, C)


# -----------------------------------------------------------------------------
# Parameter construction (deterministic, synthetic)
# -----------------------------------------------------------------------------
def _he(key, shape, fan_in):
    return jax.random.normal(key, shape, jnp.float32) * jnp.sqrt(2.0 / fan_in)


def _bn_fold(c):
    # fresh BatchNorm2d: gamma=1, beta=0, running_mean=0, running_var=1 (inference mode)
    gamma = jnp.ones((c,), jnp.float32)
    beta = jnp.zeros((c,), jnp.float32)
    mean = jnp.zeros((c,), jnp.float32)
    var = jnp.ones((c,), jnp.float32)
    scale = gamma / jnp.sqrt(var + EPS)
    shift = beta - mean * scale
    return scale, shift


def _conv_bn_params(key, kh, kw, cin, cout):
    w = _he(key, (kh, kw, cin, cout), kh * kw * cin)
    scale, shift = _bn_fold(cout)
    w_folded = (w * scale).astype(jnp.bfloat16)      # fold BN scale into bf16 weights
    return w_folded, shift.reshape(1, cout)


def _make_bottleneck(key, cin, width, stride, downsample):
    k1, k2, k3, k4 = jax.random.split(key, 4)
    p = {"stride": stride}
    p["w1"], p["b1"] = _conv_bn_params(k1, 1, 1, cin, width)
    p["w2"], p["b2"] = _conv_bn_params(k2, 3, 3, width, width)
    p["w3"], p["b3"] = _conv_bn_params(k3, 1, 1, width, width * 4)
    if downsample:
        p["wd"], p["bd"] = _conv_bn_params(k4, 1, 1, cin, width * 4)
    return p


def make_params(key, in_channels=12, num_classes=43):
    keys = jax.random.split(key, 8)
    params = {}
    params["conv1_w"], params["bn1_b"] = _conv_bn_params(keys[0], 7, 7, in_channels, 64)

    layer_cfg = [  # (width, num_blocks, first_stride)
        (64, 3, 1),
        (128, 4, 2),
        (256, 6, 2),
        (512, 3, 2),
    ]
    layers = []
    cin = 64
    for li, (width, nblocks, first_stride) in enumerate(layer_cfg):
        blk_keys = jax.random.split(keys[1 + li], nblocks)
        blocks = []
        for bi in range(nblocks):
            stride = first_stride if bi == 0 else 1
            downsample = (bi == 0)  # channel change (and/or stride) in the first block
            blocks.append(_make_bottleneck(blk_keys[bi], cin, width, stride, downsample))
            cin = width * 4
        layers.append(blocks)
    params["layers"] = layers

    params["fc_w"] = _he(keys[5], (2048, num_classes), 2048).astype(jnp.bfloat16)
    params["fc_b"] = (jax.random.normal(keys[6], (num_classes,), jnp.float32) * 0.01
                      ).reshape(1, num_classes)
    return params


# -----------------------------------------------------------------------------
# Forward pass (ResNet-50)
# -----------------------------------------------------------------------------
def _bottleneck_forward(x, p):
    identity = x
    out = conv_block(x, p["w1"], p["b1"], stride=1, relu=True)
    out = conv_block(out, p["w2"], p["b2"], stride=p["stride"], relu=True)
    if "wd" in p:
        identity = conv_block(x, p["wd"], p["bd"], stride=p["stride"], relu=False)
    # final 1x1 conv + BN + residual add + ReLU, all fused in one kernel epilogue
    return conv_block(out, p["w3"], p["b3"], stride=1, relu=True, residual=identity)


def big_earth_net_resnet50_forward(x_nchw, params):
    # x_nchw: [N, 12, H, W] (PyTorch layout)  ->  logits [N, 43]
    x = jnp.transpose(x_nchw, (0, 2, 3, 1)).astype(jnp.float32)  # NHWC

    x = conv_block(x, params["conv1_w"], params["bn1_b"], stride=2, relu=True)
    x = maxpool_3x3_s2(x)

    for layer in params["layers"]:
        for block in layer:
            x = _bottleneck_forward(x, block)

    feat = global_avgpool(x)  # [N, 2048]
    logits = matmul_bias_act(feat, params["fc_w"], params["fc_b"], relu=False)
    return logits


# -----------------------------------------------------------------------------
if __name__ == "__main__":
    key = jax.random.PRNGKey(0)
    pkey, xkey = jax.random.split(key)

    params = make_params(pkey, in_channels=12, num_classes=43)

    # Small but structure-consistent input: 32x32 spatial survives the 32x downsampling.
    x = jax.random.normal(xkey, (2, 12, 32, 32), jnp.float32)  # NCHW, like PyTorch

    logits = big_earth_net_resnet50_forward(x, params)
    logits = jax.block_until_ready(logits)

    assert logits.shape == (2, 43), logits.shape
    assert bool(jnp.all(jnp.isfinite(logits)))
    print("KERNEL_OK")
</pallas_src>

<mosaic_0001>
module attributes {stable_mosaic.version = 11 : i64} {
  func.func @_matmul_bias_kernel(%arg0: i32, %arg1: i32, %arg2: memref<256x588xbf16, #tpu.memory_space<vmem>>, %arg3: memref<588x64xbf16, #tpu.memory_space<vmem>>, %arg4: memref<1x64xf32, #tpu.memory_space<vmem>>, %arg5: memref<256x64xf32, #tpu.memory_space<vmem>>) attributes {dimension_semantics = [#tpu.dimension_semantics<parallel>, #tpu.dimension_semantics<parallel>], iteration_bounds = array<i64: 2, 1>, scalar_prefetch = 0 : i64, scratch_operands = 0 : i64, tpu.core_type = #tpu.core_type<tc>, window_params = [{transform_indices = @transform_0, window_bounds = array<i64: 256, 588>}, {transform_indices = @transform_1, window_bounds = array<i64: 588, 64>}, {transform_indices = @transform_2, window_bounds = array<i64: 1, 64>}, {transform_indices = @transform_3, window_bounds = array<i64: 256, 64>}]} {
    %c0 = arith.constant 0 : index
    %c0_0 = arith.constant 0 : index
    %0 = vector.load %arg2[%c0, %c0_0] : memref<256x588xbf16, #tpu.memory_space<vmem>>, vector<256x588xbf16>
    %c0_1 = arith.constant 0 : index
    %c0_2 = arith.constant 0 : index
    %1 = vector.load %arg3[%c0_1, %c0_2] : memref<588x64xbf16, #tpu.memory_space<vmem>>, vector<588x64xbf16>
    %cst = arith.constant dense<0.000000e+00> : vector<256x64xf32>
    %2 = tpu.matmul %0, %1, %cst {dimension_numbers = #tpu.dot_dimension_numbers<[1], [0], [0], [1], [0, 0, 1, 1], [], []>} : vector<256x588xbf16>, vector<588x64xbf16>, vector<256x64xf32> -> vector<256x64xf32>
    %c0_3 = arith.constant 0 : index
    %c0_4 = arith.constant 0 : index
    %3 = vector.load %arg4[%c0_3, %c0_4] : memref<1x64xf32, #tpu.memory_space<vmem>>, vector<1x64xf32>
    %4 = vector.broadcast %3 : vector<1x64xf32> to vector<256x64xf32>
    %5 = arith.addf %2, %4 : vector<256x64xf32>
    %cst_5 = arith.constant 0.000000e+00 : f32
    %6 = vector.broadcast %cst_5 : f32 to vector<256x64xf32>
    %7 = arith.maximumf %5, %6 : vector<256x64xf32>
    %c0_6 = arith.constant 0 : index
    %c0_7 = arith.constant 0 : index
    %8 = vector.load %arg5[%c0_6, %c0_7] : memref<256x64xf32, #tpu.memory_space<vmem>>, vector<256x64xf32>
    tpu.vector_store %arg5[%c0_6, %c0_7], %7 {strides = array<i32>} : memref<256x64xf32, #tpu.memory_space<vmem>>, vector<256x64xf32>,
    return
  }
  func.func @transform_0(%arg0: i32, %arg1: i32) -> (i32, i32) {
    %c0_i32 = arith.constant 0 : i32
    %c0_i32_0 = arith.constant 0 : i32
    return %arg0, %c0_i32 : i32, i32
  }
  func.func @transform_1(%arg0: i32, %arg1: i32) -> (i32, i32) {
    %c0_i32 = arith.constant 0 : i32
    %c0_i32_0 = arith.constant 0 : i32
    return %c0_i32, %arg1 : i32, i32
  }
  func.func @transform_2(%arg0: i32, %arg1: i32) -> (i32, i32) {
    %c0_i32 = arith.constant 0 : i32
    %c0_i32_0 = arith.constant 0 : i32
    return %c0_i32, %arg1 : i32, i32
  }
  func.func @transform_3(%arg0: i32, %arg1: i32) -> (i32, i32) {
    %c0_i32 = arith.constant 0 : i32
    return %arg0, %arg1 : i32, i32
  }
}

</mosaic_0001>

<bundles_post_ra>
// kernel: tpu_custom_call.1
= control target key start
LH: loop header
LB: loop body
LE: loop exit
PB: predicated region body
PF: predicated region fallthrough
CT: control target
= control target key end

     0   :  { %s2399_s12 = smov 0   ;;  %s2401_s13 = smov 0   ;;  %s2859_s0 = inlined_call_operand.vmem [shape: bf16[512,588], index: 0, kind: input, shape index: {}]   ;;  %s2860_s1 = inlined_call_operand.vmem [shape: bf16[588,64], index: 1, kind: input, shape index: {}]   ;;  %s2861_s2 = inlined_call_operand.vmem [shape: f32[1,64], index: 2, kind: input, shape index: {}]   ;;  %s2862_s3 = inlined_call_operand.vmem [shape: f32[512,64], index: 3, kind: output, shape index: {}]  }
   0x1   :  { %s2403_s14 = smov 0  }
   0x2 LB: > { %s25_s15 = sadd.s32 1, %s2373_s13  ;;  %p1736_p0 = scmp.ge.s32.totalorder %s2377_s14, 1  ;;  %s2377_s14 = sphi %s2403_s14, %s13_s14   ;;  %s2373_s13 = sphi %s2401_s13, %s2864_s13   ;;  %s2369_s12 = sphi %s2399_s12, %s2863_s12  }
   0x3   : > { %p27_p1 = scmp.ge.s32.totalorder %s25_s15, 2  ;;  %p170_p2 = scmp.lt.s32.totalorder %s2377_s14, 3 }
   0x5   : > { %s2866_s15 = smov (%p27_p1, %s25_s15), 0  ;;  %p171_p3 = pnand %p1736_p0, %p170_p2 }
   0x6   : > { %v2206_v0 = vld [vmem:[%s2860_s1 + $0x40] sm:$0xff] (!%p171_p3)   ;;  %s1737_s18 = sshll.u32 (!%p171_p3), %s2369_s12, 5  ;;  %v2208_v2 = vld [vmem:[%s2860_s1 + $0x48] sm:$0xff] (!%p171_p3)   ;;  %v2210_v4 = vld [vmem:[%s2860_s1 + $0x50] sm:$0xff] (!%p171_p3)   ;;  %vm1076_vm0 = vcmask (!%p171_p3), 1045504   ;;  %vm1027_vm1 = vcmask (!%p171_p3), 621568  }
   0x7   : > { %174 = sbr.rel (%p171_p3) target bundleno = 415 (0x19f), region = 32  ;;  %v2207_v1 = vld [vmem:[%s2860_s1] sm:$0xff] (!%p171_p3)   ;;  %1877 = vmatprep.subr.bf16.mxu0 (!%p171_p3), %v2206_v0  ;;  %2164 = vmatprep.subr.bf16.mxu1 (!%p171_p3), %v2206_v0  ;;  %p206_p4 = scmp.lt.s32.totalorder (!%p171_p3), %s1737_s18, 63  ;;  %v2209_v3 = vld [vmem:[%s2860_s1 + $0x8] sm:$0xff] (!%p171_p3)   ;;  %v2211_v5 = vld [vmem:[%s2860_s1 + $0x10] sm:$0xff] (!%p171_p3)   ;;  %vm1595_vm2 = vcmask (!%p171_p3), 523264  }
   0x8   : > { %1878 = vmatpush3.bf16.msra.mxu0 (!%p171_p3), %v2207_v1  ;;  %2172 = vmatpush3.bf16.msra.mxu1 (!%p171_p3), %v2207_v1  ;;  %v2212_v6 = vld [vmem:[%s2860_s1 + $0x58] sm:$0xff] (!%p171_p3)   ;;  %v2214_v8 = vld [vmem:[%s2860_s1 + $0x60] sm:$0xff] (!%p171_p3)   ;;  %v2216_v10 = vld [vmem:[%s2860_s1 + $0x68] sm:$0xff] (!%p171_p3)  }
   0x9   : > { %1879 = vmatprep.subr.bf16.mxu0 (!%p171_p3), %v2208_v2  ;;  %2165 = vmatprep.subr.bf16.mxu1 (!%p171_p3), %v2208_v2  ;;  %v2213_v7 = vld [vmem:[%s2860_s1 + $0x18] sm:$0xff] (!%p171_p3)   ;;  %v2215_v9 = vld [vmem:[%s2860_s1 + $0x20] sm:$0xff] (!%p171_p3)   ;;  %v2217_v13 = vld [vmem:[%s2860_s1 + $0x28] sm:$0xff] (!%p171_p3)  }
   0xa   : > { %v2218_v14 = vld [vmem:[%s2860_s1 + $0x70] sm:$0xff] (!%p171_p3)   ;;  %v2220_v16 = vld [vmem:[%s2860_s1 + $0x78] sm:$0xff] (!%p171_p3)   ;;  %v2228_v18 = vld [vmem:[%s2860_s1 + $0xc0] sm:$0xff] (!%p171_p3)  }
   0xb   : > { %v2219_v15 = vld [vmem:[%s2860_s1 + $0x30] sm:$0xff] (!%p171_p3)   ;;  %v2221_v17 = vld [vmem:[%s2860_s1 + $0x38] sm:$0xff] (!%p171_p3)   ;;  %v2231_v19 = vld [vmem:[%s2860_s1 + $0x100] sm:$0xff] (!%p171_p3)  }
   0xc   : > { %1880 = vmatpush3.bf16.msra.mxu0 (!%p171_p3), %v2209_v3  ;;  %2173 = vmatpush3.bf16.msra.mxu1 (!%p171_p3), %v2209_v3  ;;  %v2229_v22 = vld [vmem:[%s2860_s1 + $0x80] sm:$0xff] (!%p171_p3)   ;;  %v2230_v23 = vld [vmem:[%s2860_s1 + $0xc8] sm:$0xff] (!%p171_p3)   ;;  %v2239_v28 = vld [vmem:[%s2860_s1 + $0xd0] sm:$0xff] (!%p171_p3)  }
   0xd   : > { %1881 = vmatprep.subr.bf16.mxu0 (!%p171_p3), %v2210_v4  ;;  %2166 = vmatprep.subr.bf16.mxu1 (!%p171_p3), %v2210_v4  ;;  %v2232_v26 = vld [vmem:[%s2860_s1 + $0x88] sm:$0xff] (!%p171_p3)   ;;  %v2240_v30 = vld [vmem:[%s2860_s1 + $0x90] sm:$0xff] (!%p171_p3)   ;;  %v2241_v31 = vld [vmem:[%s2860_s1 + $0xd8] sm:$0xff] (!%p171_p3)  }
   0xe   : > { %s2868_s18 = smov (!%p206_p4, %s1737_s18), 63  ;;  %v2260_v34 = vld [vmem:[%s2860_s1 + $0x108] sm:$0xff]   ;;  %v2242_v35 = vld [vmem:[%s2860_s1 + $0x98] sm:$0xff]   ;;  %v2249_v37 = vld [vmem:[%s2860_s1 + $0xe0] sm:$0xff]  }
   0xf   : > { %s2181_s4 = smul.u32 20, %s2868_s18  ;;  %v2250_v39 = vld [vmem:[%s2860_s1 + $0xa0] sm:$0xff]   ;;  %v2251_v40 = vld [vmem:[%s2860_s1 + $0xe8] sm:$0xff]   ;;  %v2276_v43 = vld [vmem:[%s2860_s1 + $0x110] sm:$0xff]   ;;  %s1740_s29 = sshll.u32 %s2868_s18, 3 }
  0x10   : > { %1882 = vmatpush3.bf16.msra.mxu0 %v2211_v5  ;;  %2174 = vmatpush3.bf16.msra.mxu1 %v2211_v5  ;;  %v2252_v44 = vld [vmem:[%s2860_s1 + $0xa8] sm:$0xff]   ;;  %v2259_v45 = vld [vmem:[%s2860_s1 + $0xf0] sm:$0xff]   ;;  %v2262_v49 = vld [vmem:[%s2860_s1 + $0xf8] sm:$0xff]   ;;  %s2724_s5 = scalar_lea.vmem %s2862_s3, %s1740_s29 }
  0x11   : > { %1883 = vmatprep.subr.bf16.mxu0 %v2212_v6  ;;  %2167 = vmatprep.subr.bf16.mxu1 %v2212_v6  ;;  %s2450_s11 = scalar_lea.vmem %s2859_s0, %s2181_s4  ;;  %v2261_v48 = vld [vmem:[%s2860_s1 + $0xb0] sm:$0xff]   ;;  %v2289_v52 = vld [vmem:[%s2860_s1 + $0x118] sm:$0xff]   ;;  %v2308_v58 = vld [vmem:[%s2860_s1 + $0x120] sm:$0x3f]  }
  0x12   : > { %v2224_v11 = vld [vmem:[%s2450_s11 + $0x4] ss:$20 sps:$4 sm:$0xff]   ;;  %v2222_v20 = vld [vmem:[%s2450_s11] ss:$20 sps:$4 sm:$0xff]   ;;  %v2237_v27 = vld [vmem:[%s2450_s11 + $0x28] ss:$20 sps:$4 sm:$0xff]  }
  0x13   : > { %v2227_v12 = vld [vmem:[%s2450_s11 + $0x1e4] ss:$20 sps:$4 sm:$0xff]   ;;  %1112 = vmatprep.mubr.bf16.mxu0 %v2224_v11  ;;  %v2225_v21 = vld [vmem:[%s2450_s11 + $0x1e0] ss:$20 sps:$4 sm:$0xff]   ;;  %v2238_v29 = vld [vmem:[%s2450_s11 + $0x208] ss:$20 sps:$4 sm:$0xff]  }
  0x14   : > { %1884 = vmatpush3.bf16.msra.mxu0 %v2213_v7  ;;  %2175 = vmatpush3.bf16.msra.mxu1 %v2213_v7  ;;  %v2233_v24 = vld [vmem:[%s2450_s11 + $0x2c] ss:$20 sps:$4 sm:$0xff]   ;;  %v2243_v32 = vld [vmem:[%s2450_s11 + $0x54] ss:$20 sps:$4 sm:$0xff]   ;;  %v2247_v36 = vld [vmem:[%s2450_s11 + $0x50] ss:$20 sps:$4 sm:$0xff]  }
  0x15   : > { %1885 = vmatprep.subr.bf16.mxu0 %v2214_v8  ;;  %2168 = vmatprep.subr.bf16.mxu1 %v2214_v8  ;;  %v2235_v25 = vld [vmem:[%s2450_s11 + $0x20c] ss:$20 sps:$4 sm:$0xff]   ;;  %v2245_v33 = vld [vmem:[%s2450_s11 + $0x234] ss:$20 sps:$4 sm:$0xff]   ;;  %v2248_v38 = vld [vmem:[%s2450_s11 + $0x230] ss:$20 sps:$4 sm:$0xff]  }
  0x16   : > { %1208 = vmatprep.mubr.bf16.mxu1 %v2227_v12  ;;  %v2253_v41 = vld [vmem:[%s2450_s11 + $0x7c] ss:$20 sps:$4 sm:$0xff]   ;;  %v2257_v46 = vld [vmem:[%s2450_s11 + $0x78] ss:$20 sps:$4 sm:$0xff]   ;;  %v2269_v55 = vld [vmem:[%s2450_s11 + $0xa0] ss:$20 sps:$4 sm:$0xff]  }
  0x17   : > { %v2255_v42 = vld [vmem:[%s2450_s11 + $0x25c] ss:$20 sps:$4 sm:$0xff]   ;;  %v2258_v47 = vld [vmem:[%s2450_s11 + $0x258] ss:$20 sps:$4 sm:$0xff]   ;;  %v2272_v57 = vld [vmem:[%s2450_s11 + $0x34] ss:$20 sps:$4 sm:$0xff]  }
  0x18   : > { %1886 = vmatpush3.bf16.msra.mxu0 %v2215_v9  ;;  %2176 = vmatpush3.bf16.msra.mxu1 %v2215_v9  ;;  %v2264_v50 = vld [vmem:[%s2450_s11 + $0xa4] ss:$20 sps:$4 sm:$0xff]   ;;  %v2268_v51 = vld [vmem:[%s2450_s11 + $0xc] ss:$20 sps:$4 sm:$0xff]   ;;  %v2266_v54 = vld [vmem:[%s2450_s11 + $0x8] ss:$20 sps:$4 sm:$0xff]  }
  0x19   : > { %1887 = vmatprep.subr.bf16.mxu0 %v2216_v10  ;;  %2169 = vmatprep.subr.bf16.mxu1 %v2216_v10  ;;  %v2263_v53 = vld [vmem:[%s2860_s1 + $0xb8] sm:$0xff]   ;;  %v2270_v56 = vld [vmem:[%s2450_s11 + $0xcc] ss:$20 sps:$4 sm:$0xff]   ;;  %v1078_v59 = vsel %vm1076_vm0, %v2308_v58, 0  ;;  %v2275_v61 = vld [vmem:[%s2450_s11 + $0x30] ss:$20 sps:$4 sm:$0xff]  }
  0x1a   : > { %v2274_v60 = vld [vmem:[%s2450_s11 + $0xc8] ss:$20 sps:$4 sm:$0xff]   ;;  %v2281_v0 = vld [vmem:[%s2450_s11 + $0xf0] ss:$20 sps:$4 sm:$0xff]   ;;  %v2282_v1 = vld [vmem:[%s2450_s11 + $0x58] ss:$20 sps:$4 sm:$0xff]  }
  0x1b   : > { %v2277_v62 = vld [vmem:[%s2450_s11 + $0xf4] ss:$20 sps:$4 sm:$0xff]   ;;  %v2279_v63 = vld [vmem:[%s2450_s11 + $0x5c] ss:$20 sps:$4 sm:$0xff]   ;;  %v2285_v3 = vld [vmem:[%s2450_s11 + $0x84] ss:$20 sps:$4 sm:$0xff]  }
  0x1c   : > { %1888 = vmatpush3.bf16.msra.mxu0 %v2217_v13  ;;  %2177 = vmatpush3.bf16.msra.mxu1 %v2217_v13  ;;  %v2283_v2 = vld [vmem:[%s2450_s11 + $0x11c] ss:$20 sps:$4 sm:$0xff]   ;;  %v2287_v4 = vld [vmem:[%s2450_s11 + $0x118] ss:$20 sps:$4 sm:$0xff]   ;;  %v2288_v5 = vld [vmem:[%s2450_s11 + $0x80] ss:$20 sps:$4 sm:$0xff]  }
  0x1d   : > { %1889 = vmatprep.subr.bf16.mxu0 %v2218_v14  ;;  %2170 = vmatprep.subr.bf16.mxu1 %v2218_v14  ;;  %v2290_v6 = vld [vmem:[%s2450_s11 + $0x144] ss:$20 sps:$4 sm:$0xff]   ;;  %v2292_v7 = vld [vmem:[%s2450_s11 + $0xac] ss:$20 sps:$4 sm:$0xff]   ;;  %v2295_v9 = vld [vmem:[%s2450_s11 + $0xa8] ss:$20 sps:$4 sm:$0xff]  }
  0x1e   : > { %v2294_v8 = vld [vmem:[%s2450_s11 + $0x140] ss:$20 sps:$4 sm:$0xff]   ;;  %v2300_v12 = vld [vmem:[%s2450_s11 + $0x168] ss:$20 sps:$4 sm:$0xff]   ;;  %v2301_v13 = vld [vmem:[%s2450_s11 + $0xd0] ss:$20 sps:$4 sm:$0xff]  }
  0x1f   : > { %v2296_v10 = vld [vmem:[%s2450_s11 + $0x16c] ss:$20 sps:$4 sm:$0xff]   ;;  %v2298_v11 = vld [vmem:[%s2450_s11 + $0xd4] ss:$20 sps:$4 sm:$0xff]  }
  0x20   : > { %1890 = vmatpush3.bf16.msra.mxu0 %v2219_v15  ;;  %2178 = vmatpush3.bf16.msra.mxu1 %v2219_v15  ;;  %v2302_v14 = vld [vmem:[%s2450_s11 + $0x194] ss:$20 sps:$4 sm:$0xff]   ;;  %v2304_v15 = vld [vmem:[%s2450_s11 + $0xfc] ss:$20 sps:$4 sm:$0xff]  }
  0x21   : > { %1891 = vmatprep.subr.bf16.mxu0 %v2220_v16  ;;  %2171 = vmatprep.subr.bf16.mxu1 %v2220_v16  ;;  %v2306_v16 = vld [vmem:[%s2450_s11 + $0x190] ss:$20 sps:$4 sm:$0xff]  }
  0x24   : > { %1892 = vmatpush3.bf16.msra.mxu0 %v2221_v17  ;;  %2179 = vmatpush3.bf16.msra.mxu1 %v2221_v17  ;;  %v2307_v17 = vld [vmem:[%s2450_s11 + $0xf8] ss:$20 sps:$4 sm:$0xff]  }
  0x25   : > { %1989 = vmatprep.subr.bf16.mxu1 %v2228_v18  ;;  %2122 = vmatprep.subr.bf16.mxu0 %v2231_v19  ;;  %v2309_v18 = vld [vmem:[%s2450_s11 + $0x1bc] ss:$20 sps:$4 sm:$0xff]  }
  0x27   : > { %1113 = vmatmul.mubr.bf16.vlgmr.msra.gmra.mrb[0].mxu0 %v2222_v20  ;;  %1209 = vmatmul.mubr.bf16.vlgmr.msra.gmra.mrb[0].mxu1 %v2225_v21  ;;  %v2313_v20 = vld [vmem:[%s2450_s11 + $0x1b8] ss:$20 sps:$4 sm:$0xff]   ;;  %v2314_v21 = vld [vmem:[%s2450_s11 + $0x120] ss:$20 sps:$4 sm:$0xff]  }
  0x28   : > { %1990 = vmatpush3.bf16.msra.mxu1 %v2229_v22  ;;  %2123 = vmatpush3.bf16.msra.mxu0 %v2231_v19  ;;  %v2311_v19 = vld [vmem:[%s2450_s11 + $0x124] ss:$20 sps:$4 sm:$0xff]   ;;  %v2315_v22 = vld [vmem:[%s2450_s11 + $0x14c] ss:$20 sps:$4 sm:$0xff]  }
  0x29   : > { %1991 = vmatprep.subr.bf16.mxu1 %v2230_v23  ;;  %1120 = vmatprep.mubr.bf16.mxu0 %v2233_v24  ;;  %v2317_v23 = vld [vmem:[%s2450_s11 + $0x10] ss:$20 sps:$4 sm:$0xff]   ;;  %v2318_v24 = vld [vmem:[%s2450_s11 + $0x148] ss:$20 sps:$4 sm:$0xff]  }
  0x2a   : > { %1216 = vmatprep.mubr.bf16.mxu1 %v2235_v25  ;;  %2124 = vmatprep.subr.bf16.mxu0 %v2260_v34  ;;  %v2319_v25 = vld [vmem:[%s2450_s11 + $0x38] ss:$20 sps:$4 sm:$0xff]  }
  0x2c   : > { %1992 = vmatpush3.bf16.msra.mxu1 %v2232_v26  ;;  %2125 = vmatpush3.bf16.msra.mxu0 %v2260_v34  ;;  %v2320_v26 = vld [vmem:[%s2450_s11 + $0x174] ss:$20 sps:$4 sm:$0xff]   ;;  %v2330_v34 = vld [vmem:[%s2450_s11 + $0x1c4] ss:$20 sps:$4 sm:$0xff]  }
  0x2d   : > { %1993 = vmatprep.subr.bf16.mxu1 %v2239_v28  ;;  %2126 = vmatprep.subr.bf16.mxu0 %v2276_v43  ;;  %v2323_v28 = vld [vmem:[%s2450_s11 + $0x170] ss:$20 sps:$4 sm:$0xff]  }
  0x2f   : > { %1121 = vmatmul.mubr.bf16.gmra.mrb[4].mxu0 %v2237_v27  ;;  %1217 = vmatmul.mubr.bf16.gmra.mrb[4].mxu1 %v2238_v29  ;;  %v2322_v27 = vld [vmem:[%s2450_s11 + $0x60] ss:$20 sps:$4 sm:$0xff]   ;;  %v2324_v29 = vld [vmem:[%s2450_s11 + $0x88] ss:$20 sps:$4 sm:$0xff]  }
  0x30   : > { %1994 = vmatpush3.bf16.msra.mxu1 %v2240_v30  ;;  %1128 = vmatprep.mubr.bf16.mxu0 %v2243_v32  ;;  %v2325_v30 = vld [vmem:[%s2450_s11 + $0x19c] ss:$20 sps:$4 sm:$0xff]   ;;  %v2328_v32 = vld [vmem:[%s2450_s11 + $0x198] ss:$20 sps:$4 sm:$0xff]  }
  0x31   : > { %1995 = vmatprep.subr.bf16.mxu1 %v2241_v31  ;;  %1224 = vmatprep.mubr.bf16.mxu1 %v2245_v33  ;;  %v2327_v31 = vld [vmem:[%s2450_s11 + $0xb0] ss:$20 sps:$4 sm:$0xff]   ;;  %v2329_v33 = vld [vmem:[%s2450_s11 + $0xd8] ss:$20 sps:$4 sm:$0xff]  }
  0x32   : > { %2127 = vmatpush3.bf16.msra.mxu0 %v2276_v43  ;;  %v2342_v43 = vld [vmem:[%s2450_s11 + $0x1a0] ss:$20 sps:$4 sm:$0xff]  }
  0x33   : > { %2128 = vmatprep.subr.bf16.mxu0 %v2289_v52 }
  0x34   : > { %1996 = vmatpush3.bf16.msra.mxu1 %v2242_v35  ;;  %v2332_v35 = vld [vmem:[%s2450_s11 + $0x100] ss:$20 sps:$4 sm:$0xff]  }
  0x35   : > { %1997 = vmatprep.subr.bf16.mxu1 %v2249_v37  ;;  %v2334_v37 = vld [vmem:[%s2450_s11 + $0x128] ss:$20 sps:$4 sm:$0xff]  }
  0x36   : > { %2129 = vmatpush3.bf16.msra.mxu0 %v2289_v52  ;;  %v2353_v52 = vld [vmem:[%s2450_s11 + $0x260] ss:$20 sps:$4 sm:$0xff]  }
  0x37   : > { %1129 = vmatmul.mubr.bf16.gmra.mrb[8].mxu0 %v2247_v36  ;;  %1225 = vmatmul.mubr.bf16.gmra.mrb[8].mxu1 %v2248_v38  ;;  %v2333_v36 = vld [vmem:[%s2450_s11 + $0x1c0] ss:$20 sps:$4 sm:$0xff]  }
  0x38   : > { %1998 = vmatpush3.bf16.msra.mxu1 %v2250_v39  ;;  %1136 = vmatprep.mubr.bf16.mxu0 %v2253_v41  ;;  %v2335_v38 = vld [vmem:[%s2450_s11 + $0x1ec] ss:$20 sps:$4 sm:$0xff]   ;;  %v2337_v39 = vld [vmem:[%s2450_s11 + $0x150] ss:$20 sps:$4 sm:$0xff]  }
  0x39   : > { %1999 = vmatprep.subr.bf16.mxu1 %v2251_v40  ;;  %1232 = vmatprep.mubr.bf16.mxu1 %v2255_v42  ;;  %v2338_v40 = vld [vmem:[%s2450_s11 + $0x1e8] ss:$20 sps:$4 sm:$0xff]   ;;  %v2339_v41 = vld [vmem:[%s2450_s11 + $0x178] ss:$20 sps:$4 sm:$0xff]  }
  0x3a   : > { %2180 = vmatprep.subr.msk.bf16.mxu0 %vm1076_vm0, %v2308_v58  ;;  %v2340_v42 = vld [vmem:[%s2450_s11 + $0x214] ss:$20 sps:$4 sm:$0xff]  }
  0x3b   : > { %2131 = vmatpush3.bf16.msra.mxu0 %v1078_v59 }
  0x3c   : > { %2000 = vmatpush3.bf16.msra.mxu1 %v2252_v44  ;;  %v2343_v44 = vld [vmem:[%s2450_s11 + $0x210] ss:$20 sps:$4 sm:$0xff]  }
  0x3d   : > { %2001 = vmatprep.subr.bf16.mxu1 %v2259_v45  ;;  %v2344_v45 = vld [vmem:[%s2450_s11 + $0x1c8] ss:$20 sps:$4 sm:$0xff]  }
  0x3f   : > { %1137 = vmatmul.mubr.bf16.gmra.mrb[12].mxu0 %v2257_v46  ;;  %1233 = vmatmul.mubr.bf16.gmra.mrb[12].mxu1 %v2258_v47  ;;  %v2345_v46 = vld [vmem:[%s2450_s11 + $0x23c] ss:$20 sps:$4 sm:$0xff]  }
  0x40   : > { %2002 = vmatpush3.bf16.msra.mxu1 %v2261_v48  ;;  %1144 = vmatprep.mubr.bf16.mxu0 %v2264_v50  ;;  %v2347_v47 = vld [vmem:[%s2450_s11 + $0x1f0] ss:$20 sps:$4 sm:$0xff]   ;;  %v2348_v48 = vld [vmem:[%s2450_s11 + $0x238] ss:$20 sps:$4 sm:$0xff]  }
  0x41   : > { %2003 = vmatprep.subr.bf16.mxu1 %v2262_v49  ;;  %1273 = vmatprep.mubr.bf16.mxu1 %v2268_v51  ;;  %v2349_v49 = vld [vmem:[%s2450_s11 + $0x218] ss:$20 sps:$4 sm:$0xff]   ;;  %v2352_v51 = vld [vmem:[%s2450_s11 + $0x240] ss:$20 sps:$4 sm:$0xff]  }
  0x42   : > { %v2350_v50 = vld [vmem:[%s2450_s11 + $0x264] ss:$20 sps:$4 sm:$0xff]  }
  0x44   : > { %2004 = vmatpush3.bf16.msra.mxu1 %v2263_v53  ;;  %v2354_v53 = vld [vmem:[%s2450_s11 + $0x268] ss:$20 sps:$4 sm:$0xff]  }
  0x47   : > { %1145 = vmatmul.mubr.bf16.gmra.mrb[16].mxu0 %v2269_v55  ;;  %1274 = vmatmul.mubr.bf16.vlgmr.msra.gmra.mrb[16].mxu1 %v2266_v54 }
  0x48   : > { %1152 = vmatprep.mubr.bf16.mxu0 %v2270_v56  ;;  %1281 = vmatprep.mubr.bf16.mxu1 %v2272_v57 }
  0x4f   : > { %1153 = vmatmul.mubr.bf16.gmra.mrb[20].mxu0 %v2274_v60  ;;  %1282 = vmatmul.mubr.bf16.gmra.mrb[20].mxu1 %v2275_v61 }
  0x50   : > { %1160 = vmatprep.mubr.bf16.mxu0 %v2277_v62  ;;  %1289 = vmatprep.mubr.bf16.mxu1 %v2279_v63 }
  0x57   : > { %1161 = vmatmul.mubr.bf16.gmra.mrb[24].mxu0 %v2281_v0  ;;  %1290 = vmatmul.mubr.bf16.gmra.mrb[24].mxu1 %v2282_v1 }
  0x58   : > { %1168 = vmatprep.mubr.bf16.mxu0 %v2283_v2  ;;  %1297 = vmatprep.mubr.bf16.mxu1 %v2285_v3 }
  0x5f   : > { %1169 = vmatmul.mubr.bf16.gmra.mrb[28].mxu0 %v2287_v4  ;;  %1298 = vmatmul.mubr.bf16.gmra.mrb[28].mxu1 %v2288_v5 }
  0x60   : > { %1176 = vmatprep.mubr.bf16.mxu0 %v2290_v6  ;;  %1305 = vmatprep.mubr.bf16.mxu1 %v2292_v7 }
  0x67   : > { %1177 = vmatmul.mubr.bf16.gmra.mrb[32].mxu0 %v2294_v8  ;;  %1306 = vmatmul.mubr.bf16.gmra.mrb[32].mxu1 %v2295_v9 }
  0x68   : > { %1184 = vmatprep.mubr.bf16.mxu0 %v2296_v10  ;;  %1313 = vmatprep.mubr.bf16.mxu1 %v2298_v11 }
  0x6f   : > { %1185 = vmatmul.mubr.bf16.gmra.mrb[36].mxu0 %v2300_v12  ;;  %1314 = vmatmul.mubr.bf16.gmra.mrb[36].mxu1 %v2301_v13 }
  0x70   : > { %1192 = vmatprep.mubr.bf16.mxu0 %v2302_v14  ;;  %1321 = vmatprep.mubr.bf16.mxu1 %v2304_v15 }
  0x77   : > { %1193 = vmatmul.mubr.bf16.gmra.mrb[40].mxu0 %v2306_v16  ;;  %1322 = vmatmul.mubr.bf16.gmra.mrb[40].mxu1 %v2307_v17 }
  0x78   : > { %1200 = vmatprep.mubr.bf16.mxu0 %v2309_v18  ;;  %1329 = vmatprep.mubr.bf16.mxu1 %v2311_v19 }
  0x7f   : > { %1201 = vmatmul.mubr.bf16.gmra.mrb[44].mxu0 %v2313_v20  ;;  %1330 = vmatmul.mubr.bf16.gmra.mrb[44].mxu1 %v2314_v21 }
  0x80   : > { %1337 = vmatprep.mubr.bf16.mxu1 %v2315_v22  ;;  %2132 = vmatprep.mubr.msk.bf16.mxu0 %vm1027_vm1, %v2317_v23 }
  0x87   : > { %1338 = vmatmul.mubr.bf16.gmra.mrb[48].mxu1 %v2318_v24  ;;  %2133 = vmatmul.mubr.msk.bf16.vlgmr.msra.gmra.mrb[48].mxu0 %vm1027_vm1, %v2319_v25 }
  0x88   : > { %1345 = vmatprep.mubr.bf16.mxu1 %v2320_v26  ;;  %2136 = vmatprep.mubr.msk.bf16.mxu0 %vm1027_vm1, %v2322_v27 }
  0x8f   : > { %1346 = vmatmul.mubr.bf16.gmra.mrb[52].mxu1 %v2323_v28  ;;  %2137 = vmatmul.mubr.msk.bf16.gmra.mrb[52].mxu0 %vm1027_vm1, %v2324_v29 }
  0x90   : > { %1353 = vmatprep.mubr.bf16.mxu1 %v2325_v30  ;;  %2140 = vmatprep.mubr.msk.bf16.mxu0 %vm1027_vm1, %v2327_v31 }
  0x97   : > { %1354 = vmatmul.mubr.bf16.gmra.mrb[56].mxu1 %v2328_v32  ;;  %2141 = vmatmul.mubr.msk.bf16.gmra.mrb[56].mxu0 %vm1027_vm1, %v2329_v33 }
  0x98   : > { %1361 = vmatprep.mubr.bf16.mxu1 %v2330_v34  ;;  %2144 = vmatprep.mubr.msk.bf16.mxu0 %vm1027_vm1, %v2332_v35 }
  0x9f   : > { %1362 = vmatmul.mubr.bf16.gmra.mrb[60].mxu1 %v2333_v36  ;;  %2145 = vmatmul.mubr.msk.bf16.gmra.mrb[60].mxu0 %vm1027_vm1, %v2334_v37 }
  0xa0   : > { %1369 = vmatprep.mubr.bf16.mxu1 %v2335_v38  ;;  %2148 = vmatprep.mubr.msk.bf16.mxu0 %vm1027_vm1, %v2337_v39 }
  0xa7   : > { %1370 = vmatmul.mubr.bf16.gmra.mrb[64].mxu1 %v2338_v40  ;;  %2149 = vmatmul.mubr.msk.bf16.gmra.mrb[64].mxu0 %vm1027_vm1, %v2339_v41  ;;  %v2651_v40 = vld [vmem:[%s2861_s2] ss:$0 sm:$0xff] }
  0xa8   : > { %1377 = vmatprep.mubr.bf16.mxu1 %v2340_v42  ;;  %2152 = vmatprep.mubr.msk.bf16.mxu0 %vm1027_vm1, %v2342_v43 }
  0xaf   : > { %1378 = vmatmul.mubr.bf16.gmra.mrb[68].mxu1 %v2343_v44  ;;  %2153 = vmatmul.mubr.msk.bf16.gmra.mrb[68].mxu0 %vm1027_vm1, %v2344_v45 }
  0xb0   : > { %1385 = vmatprep.mubr.bf16.mxu1 %v2345_v46  ;;  %2156 = vmatprep.mubr.msk.bf16.mxu0 %vm1027_vm1, %v2347_v47 }
  0xb7   : > { %1386 = vmatmul.mubr.bf16.gmra.mrb[72].mxu1 %v2348_v48  ;;  %2157 = vmatmul.mubr.msk.bf16.gmra.mrb[72].mxu0 %vm1027_vm1, %v2349_v49 }
  0xb8   : > { %1393 = vmatprep.mubr.bf16.mxu1 %v2350_v50  ;;  %2160 = vmatprep.mubr.msk.bf16.mxu0 %vm1027_vm1, %v2352_v51 }
  0xbf   : > { %1394 = vmatmul.mubr.bf16.gmra.mrb[76].mxu1 %v2353_v52  ;;  %2161 = vmatmul.mubr.msk.bf16.gmra.mrb[76].mxu0 %vm1027_vm1, %v2354_v53 }
  0xfa   : > { %v1965_v54 = vpop.f32.mrb[0].mxu1  ;;  %v1893_v55 = vpop.f32.mrb[0].mxu0 }
  0xfb   : > { %v1966_v56 = vpop.f32.mrb[1].mxu1  ;;  %v1894_v57 = vpop.f32.mrb[1].mxu0 }
  0xfc   : > { %v2632_v58 = vadd.f32 %v1966_v56, %v1965_v54  ;;  %v1968_v59 = vpop.f32.mrb[2].mxu1  ;;  %v1895_v60 = vadd.f32 %v1894_v57, %v1893_v55  ;;  %v1896_v61 = vpop.f32.mrb[2].mxu0 }
  0xfd   : > { %v1969_v62 = vpop.f32.mrb[3].mxu1  ;;  %v1897_v63 = vpop.f32.mrb[3].mxu0 }
  0xfe   : > { %v2634_v0 = vadd.f32 %v1969_v62, %v1968_v59  ;;  %v1898_v1 = vadd.f32 %v1897_v63, %v1896_v61  ;;  %v1115_v43 = vadd.f32 %v1895_v60, %v2651_v40 }
 0x100   : > { %v1118_v50 = vadd.f32 %v1898_v1, %v2651_v40 }
 0x102   : > { %v1971_v2 = vpop.f32.mrb[4].mxu1  ;;  %v1899_v3 = vpop.f32.mrb[4].mxu0 }
 0x103   : > { %v1972_v4 = vpop.f32.mrb[5].mxu1  ;;  %v1900_v5 = vpop.f32.mrb[5].mxu0 }
 0x104   : > { %v2636_v6 = vadd.f32 %v1972_v4, %v1971_v2  ;;  %v1974_v7 = vpop.f32.mrb[6].mxu1  ;;  %v1901_v8 = vadd.f32 %v1900_v5, %v1899_v3  ;;  %v1902_v9 = vpop.f32.mrb[6].mxu0 }
 0x105   : > { %v1975_v10 = vpop.f32.mrb[7].mxu1  ;;  %v1903_v11 = vpop.f32.mrb[7].mxu0 }
 0x106   : > { %v2638_v12 = vadd.f32 %v1975_v10, %v1974_v7  ;;  %v1904_v13 = vadd.f32 %v1903_v11, %v1902_v9  ;;  %v1123_v60 = vadd.f32 %v1901_v8, %v2651_v40 }
 0x108   : > { %v1126_v1 = vadd.f32 %v1904_v13, %v2651_v40 }
 0x10a   : > { %v1977_v14 = vpop.f32.mrb[8].mxu1  ;;  %v1905_v15 = vpop.f32.mrb[8].mxu0 }
 0x10b   : > { %v1978_v16 = vpop.f32.mrb[9].mxu1  ;;  %v1906_v17 = vpop.f32.mrb[9].mxu0 }
 0x10c   : > { %v2640_v18 = vadd.f32 %v1978_v16, %v1977_v14  ;;  %v1980_v19 = vpop.f32.mrb[10].mxu1  ;;  %v1907_v20 = vadd.f32 %v1906_v17, %v1905_v15  ;;  %v1908_v21 = vpop.f32.mrb[10].mxu0 }
 0x10d   : > { %v1981_v22 = vpop.f32.mrb[11].mxu1  ;;  %v1909_v23 = vpop.f32.mrb[11].mxu0 }
 0x10e   : > { %v2642_v24 = vadd.f32 %v1981_v22, %v1980_v19  ;;  %v1910_v25 = vadd.f32 %v1909_v23, %v1908_v21  ;;  %v1131_v8 = vadd.f32 %v1907_v20, %v2651_v40 }
 0x110   : > { %v1134_v13 = vadd.f32 %v1910_v25, %v2651_v40 }
 0x112   : > { %v1983_v26 = vpop.f32.mrb[12].mxu1  ;;  %v1911_v27 = vpop.f32.mrb[12].mxu0 }
 0x113   : > { %v1984_v28 = vpop.f32.mrb[13].mxu1  ;;  %v1912_v29 = vpop.f32.mrb[13].mxu0 }
 0x114   : > { %v2644_v30 = vadd.f32 %v1984_v28, %v1983_v26  ;;  %v1986_v31 = vpop.f32.mrb[14].mxu1  ;;  %v1913_v32 = vadd.f32 %v1912_v29, %v1911_v27  ;;  %v1914_v33 = vpop.f32.mrb[14].mxu0 }
 0x115   : > { %v1987_v34 = vpop.f32.mrb[15].mxu1  ;;  %v1915_v35 = vpop.f32.mrb[15].mxu0 }
 0x116   : > { %v2646_v36 = vadd.f32 %v1987_v34, %v1986_v31  ;;  %v1916_v37 = vadd.f32 %v1915_v35, %v1914_v33  ;;  %v1139_v20 = vadd.f32 %v1913_v32, %v2651_v40 }
 0x118   : > { %v1142_v25 = vadd.f32 %v1916_v37, %v2651_v40 }
 0x11a   : > { %v2005_v38 = vpop.f32.mrb[16].mxu1  ;;  %v1917_v39 = vpop.f32.mrb[16].mxu0 }
 0x11b   : > { %v2006_v41 = vpop.f32.mrb[17].mxu1  ;;  %v1918_v42 = vpop.f32.mrb[17].mxu0 }
 0x11c   : > { %v2007_v44 = vadd.f32 %v2006_v41, %v2005_v38  ;;  %v2008_v45 = vpop.f32.mrb[18].mxu1  ;;  %v1919_v46 = vadd.f32 %v1918_v42, %v1917_v39  ;;  %v1920_v47 = vpop.f32.mrb[18].mxu0 }
 0x11d   : > { %v2009_v48 = vpop.f32.mrb[19].mxu1  ;;  %v1921_v49 = vpop.f32.mrb[19].mxu0 }
 0x11e   : > { %v2010_v51 = vadd.f32 %v2009_v48, %v2008_v45  ;;  %v1922_v52 = vadd.f32 %v1921_v49, %v1920_v47  ;;  %v2655_v53 = vadd.f32 %v2007_v44, %v1115_v43  ;;  %v1147_v32 = vadd.f32 %v1919_v46, %v2651_v40 }
 0x120   : > { %v2657_v54 = vadd.f32 %v2010_v51, %v1118_v50  ;;  %v1150_v37 = vadd.f32 %v1922_v52, %v2651_v40 }
 0x122   : > { %v2011_v55 = vpop.f32.mrb[20].mxu1  ;;  %v1923_v56 = vpop.f32.mrb[20].mxu0 }
 0x123   : > { %v2012_v57 = vpop.f32.mrb[21].mxu1  ;;  %v1924_v59 = vpop.f32.mrb[21].mxu0 }
 0x124   : > { %v2013_v61 = vadd.f32 %v2012_v57, %v2011_v55  ;;  %v2014_v62 = vpop.f32.mrb[22].mxu1  ;;  %v1925_v63 = vadd.f32 %v1924_v59, %v1923_v56  ;;  %v1926_v2 = vpop.f32.mrb[22].mxu0 }
 0x125   : > { %v2015_v3 = vpop.f32.mrb[23].mxu1  ;;  %v1927_v4 = vpop.f32.mrb[23].mxu0 }
 0x126   : > { %v2016_v5 = vadd.f32 %v2015_v3, %v2014_v62  ;;  %v1928_v7 = vadd.f32 %v1927_v4, %v1926_v2  ;;  %v2661_v9 = vadd.f32 %v2013_v61, %v1123_v60 }
 0x128   : > { %v2663_v10 = vadd.f32 %v2016_v5, %v1126_v1 }
 0x12a   : > { %v2017_v11 = vpop.f32.mrb[24].mxu1  ;;  %v1929_v14 = vpop.f32.mrb[24].mxu0 }
 0x12b   : > { %v2018_v15 = vpop.f32.mrb[25].mxu1  ;;  %v1930_v16 = vpop.f32.mrb[25].mxu0 }
 0x12c   : > { %v2019_v17 = vadd.f32 %v2018_v15, %v2017_v11  ;;  %v2020_v19 = vpop.f32.mrb[26].mxu1  ;;  %v1931_v21 = vadd.f32 %v1930_v16, %v1929_v14  ;;  %v1932_v22 = vpop.f32.mrb[26].mxu0 }
 0x12d   : > { %v2021_v23 = vpop.f32.mrb[27].mxu1  ;;  %v1933_v26 = vpop.f32.mrb[27].mxu0 }
 0x12e   : > { %v2022_v27 = vadd.f32 %v2021_v23, %v2020_v19  ;;  %v1934_v28 = vadd.f32 %v1933_v26, %v1932_v22  ;;  %v2667_v29 = vadd.f32 %v2019_v17, %v1131_v8  ;;  %v1155_v8 = vadd.f32 %v1925_v63, %v2651_v40 }
 0x130   : > { %v2669_v31 = vadd.f32 %v2022_v27, %v1134_v13  ;;  %v1158_v13 = vadd.f32 %v1928_v7, %v2651_v40 }
 0x132   : > { %v2023_v33 = vpop.f32.mrb[28].mxu1  ;;  %v1935_v34 = vpop.f32.mrb[28].mxu0 }
 0x133   : > { %v2024_v35 = vpop.f32.mrb[29].mxu1  ;;  %v1936_v38 = vpop.f32.mrb[29].mxu0 }
 0x134   : > { %v2025_v39 = vadd.f32 %v2024_v35, %v2023_v33  ;;  %v2026_v41 = vpop.f32.mrb[30].mxu1  ;;  %v1937_v42 = vadd.f32 %v1936_v38, %v1935_v34  ;;  %v1938_v43 = vpop.f32.mrb[30].mxu0 }
 0x135   : > { %v2027_v44 = vpop.f32.mrb[31].mxu1  ;;  %v1939_v45 = vpop.f32.mrb[31].mxu0 }
 0x136   : > { %v2028_v47 = vadd.f32 %v2027_v44, %v2026_v41  ;;  %v1940_v48 = vadd.f32 %v1939_v45, %v1938_v43  ;;  %v2673_v49 = vadd.f32 %v2025_v39, %v1139_v20  ;;  %v1163_v41 = vadd.f32 %v1931_v21, %v2651_v40 }
 0x138   : > { %v2675_v50 = vadd.f32 %v2028_v47, %v1142_v25 }
 0x13a   : > { %v2029_v51 = vpop.f32.mrb[32].mxu1  ;;  %v1941_v55 = vpop.f32.mrb[32].mxu0 }
 0x13b   : > { %v2030_v56 = vpop.f32.mrb[33].mxu1  ;;  %v1942_v57 = vpop.f32.mrb[33].mxu0 }
 0x13c   : > { %v2031_v59 = vadd.f32 %v2030_v56, %v2029_v51  ;;  %v2032_v60 = vpop.f32.mrb[34].mxu1  ;;  %v2678_v61 = vadd.f32 %v1942_v57, %v1941_v55  ;;  %v1944_v62 = vpop.f32.mrb[34].mxu0  ;;  %v1166_v51 = vadd.f32 %v1934_v28, %v2651_v40 }
 0x13d   : > { %v2033_v2 = vpop.f32.mrb[35].mxu1  ;;  %v1945_v3 = vpop.f32.mrb[35].mxu0 }
 0x13e   : > { %v2034_v4 = vadd.f32 %v2033_v2, %v2032_v60  ;;  %v2681_v1 = vadd.f32 %v1945_v3, %v1944_v62  ;;  %v2683_v5 = vadd.f32 %v2031_v59, %v1147_v32  ;;  %v1171_v2 = vadd.f32 %v1937_v42, %v2651_v40 }
 0x140   : > { %v2685_v11 = vadd.f32 %v2034_v4, %v1150_v37 }
 0x142   : > { %v2035_v14 = vpop.f32.mrb[36].mxu1  ;;  %v1947_v15 = vpop.f32.mrb[36].mxu0 }
 0x143   : > { %v2036_v16 = vpop.f32.mrb[37].mxu1  ;;  %v1948_v46 = vpop.f32.mrb[37].mxu0 }
 0x144   : > { %v2037_v17 = vadd.f32 %v2036_v16, %v2035_v14  ;;  %v2038_v19 = vpop.f32.mrb[38].mxu1  ;;  %v2688_v22 = vadd.f32 %v1948_v46, %v1947_v15  ;;  %v1950_v23 = vpop.f32.mrb[38].mxu0  ;;  %v1174_v16 = vadd.f32 %v1940_v48, %v2651_v40 }
 0x145   : > { %v2039_v26 = vpop.f32.mrb[39].mxu1  ;;  %v1951_v52 = vpop.f32.mrb[39].mxu0 }
 0x146   : > { %v2040_v27 = vadd.f32 %v2039_v26, %v2038_v19  ;;  %v2691_v33 = vadd.f32 %v1951_v52, %v1950_v23  ;;  %v2693_v34 = vadd.f32 %v2037_v17, %v1155_v8 }
 0x148   : > { %v2695_v35 = vadd.f32 %v2040_v27, %v1158_v13  ;;  %v1179_v27 = vadd.f32 %v2678_v61, %v2651_v40 }
 0x14a   : > { %v2041_v38 = vpop.f32.mrb[40].mxu1  ;;  %v1953_v20 = vpop.f32.mrb[40].mxu0 }
 0x14b   : > { %v2042_v39 = vpop.f32.mrb[41].mxu1  ;;  %v1954_v63 = vpop.f32.mrb[41].mxu0 }
 0x14c   : > { %v2043_v43 = vadd.f32 %v2042_v39, %v2041_v38  ;;  %v2044_v44 = vpop.f32.mrb[42].mxu1  ;;  %v2698_v45 = vadd.f32 %v1954_v63, %v1953_v20  ;;  %v1956_v25 = vpop.f32.mrb[42].mxu0 }
 0x14d   : > { %v2045_v47 = vpop.f32.mrb[43].mxu1  ;;  %v1957_v7 = vpop.f32.mrb[43].mxu0 }
 0x14e   : > { %v2046_v55 = vadd.f32 %v2045_v47, %v2044_v44  ;;  %v2701_v56 = vadd.f32 %v1957_v7, %v1956_v25  ;;  %v2703_v57 = vadd.f32 %v2043_v43, %v1163_v41 }
 0x150   : > { %v2705_v32 = vadd.f32 %v2046_v55, %v1166_v51 }
 0x152   : > { %v2047_v59 = vpop.f32.mrb[44].mxu1  ;;  %v1959_v60 = vpop.f32.mrb[44].mxu0 }
 0x153   : > { %v2048_v21 = vpop.f32.mrb[45].mxu1  ;;  %v1960_v62 = vpop.f32.mrb[45].mxu0 }
 0x154   : > { %v2049_v3 = vadd.f32 %v2048_v21, %v2047_v59  ;;  %v2050_v37 = vpop.f32.mrb[46].mxu1  ;;  %v2708_v4 = vadd.f32 %v1960_v62, %v1959_v60  ;;  %v1962_v14 = vpop.f32.mrb[46].mxu0  ;;  %v1187_v21 = vadd.f32 %v2688_v22, %v2651_v40 }
 0x155   : > { %v2051_v28 = vpop.f32.mrb[47].mxu1  ;;  %v1963_v15 = vpop.f32.mrb[47].mxu0 }
 0x156   : > { %v2052_v46 = vadd.f32 %v2051_v28, %v2050_v37  ;;  %v2711_v8 = vadd.f32 %v1963_v15, %v1962_v14  ;;  %v2713_v17 = vadd.f32 %v2049_v3, %v1171_v2  ;;  %v1190_v14 = vadd.f32 %v2691_v33, %v2651_v40 }
 0x158   : > { %v2715_v19 = vadd.f32 %v2052_v46, %v1174_v16 }
 0x15a   : > { %v2053_v23 = vpop.f32.mrb[48].mxu1  ;;  %v2134_v26 = vpop.f32.mrb[48].mxu0 }
 0x15b   : > { %v1445_v42 = vadd.f32 %v2134_v26, %v2661_v9  ;;  %v2054_v52 = vpop.f32.mrb[49].mxu1  ;;  %v1436_v13 = vpop.f32.mrb[49].mxu0  ;;  %v1182_v9 = vadd.f32 %v2681_v1, %v2651_v40 }
 0x15c   : > { %v2055_v48 = vadd.f32 %v2054_v52, %v2053_v23  ;;  %v1437_v38 = vadd.f32 %v1436_v13, %v2655_v53  ;;  %v2056_v20 = vpop.f32.mrb[50].mxu1  ;;  %v2135_v39 = vpop.f32.mrb[50].mxu0 }
 0x15d   : > { %v1565_v63 = vmax.f32 %v1445_v42, 0.0  ;;  %v1448_v61 = vadd.f32 %v2135_v39, %v2663_v10  ;;  %v2057_v41 = vpop.f32.mrb[51].mxu1  ;;  %v1439_v43 = vpop.f32.mrb[51].mxu0 }
 0x15e   : > { %v1563_v44 = vmax.f32 %v1437_v38, 0.0  ;;  %v2058_v25 = vadd.f32 %v2057_v41, %v2056_v20  ;;  %v1440_v47 = vadd.f32 %v1439_v43, %v2657_v54  ;;  %v2731_v7 = vadd.f32 %v2055_v48, %v1179_v27 }
 0x15f   : > { %1598 = vst.msk [vmem:[%s2724_s5 + $0x10] sm:$0xff] %vm1595_vm2, %v1565_v63  ;;  %v1566_v53 = vmax.f32 %v1448_v61, 0.0  ;;  %v1195_v48 = vadd.f32 %v2698_v45, %v2651_v40  ;;  %v1198_v63 = vadd.f32 %v2701_v56, %v2651_v40 }
 0x160   : > { %1596 = vst.msk [vmem:[%s2724_s5] sm:$0xff] %vm1595_vm2, %v1563_v44  ;;  %v1564_v51 = vmax.f32 %v1440_v47, 0.0  ;;  %v2737_v55 = vadd.f32 %v2058_v25, %v1182_v9 }
 0x161   : > { %1599 = vst.msk [vmem:[%s2724_s5 + $0x18] sm:$0xff] %vm1595_vm2, %v1566_v53 }
 0x162   : > { %1597 = vst.msk [vmem:[%s2724_s5 + $0x8] sm:$0xff] %vm1595_vm2, %v1564_v51  ;;  %v2059_v10 = vpop.f32.mrb[52].mxu1  ;;  %v2138_v1 = vpop.f32.mrb[52].mxu0 }
 0x163   : > { %v1461_v59 = vadd.f32 %v2138_v1, %v2673_v49  ;;  %v2060_v60 = vpop.f32.mrb[53].mxu1  ;;  %v1452_v54 = vpop.f32.mrb[53].mxu0 }
 0x164   : > { %v2061_v62 = vadd.f32 %v2060_v60, %v2059_v10  ;;  %v1453_v2 = vadd.f32 %v1452_v54, %v2667_v29  ;;  %v2062_v3 = vpop.f32.mrb[54].mxu1  ;;  %v2139_v37 = vpop.f32.mrb[54].mxu0 }
 0x165   : > { %v1569_v28 = vmax.f32 %v1461_v59, 0.0  ;;  %v1464_v49 = vadd.f32 %v2139_v37, %v2675_v50  ;;  %v2063_v15 = vpop.f32.mrb[55].mxu1  ;;  %v1455_v16 = vpop.f32.mrb[55].mxu0  ;;  %v1203_v59 = vadd.f32 %v2708_v4, %v2651_v40 }
 0x166   : > { %v1567_v46 = vmax.f32 %v1453_v2, 0.0  ;;  %v2064_v23 = vadd.f32 %v2063_v15, %v2062_v3  ;;  %v1456_v22 = vadd.f32 %v1455_v16, %v2669_v31  ;;  %v1348_v26 = vadd.f32 %v2061_v62, %v1187_v21 }
 0x167   : > { %1602 = vst.msk [vmem:[%s2724_s5 + $0x30] sm:$0xff] %vm1595_vm2, %v1569_v28  ;;  %v1570_v29 = vmax.f32 %v1464_v49, 0.0  ;;  %v1206_v2 = vadd.f32 %v2711_v8, %v2651_v40 }
 0x168   : > { %1600 = vst.msk [vmem:[%s2724_s5 + $0x20] sm:$0xff] %vm1595_vm2, %v1567_v46  ;;  %v1568_v42 = vmax.f32 %v1456_v22, 0.0  ;;  %v2755_v52 = vadd.f32 %v2064_v23, %v1190_v14 }
 0x169   : > { %1603 = vst.msk [vmem:[%s2724_s5 + $0x38] sm:$0xff] %vm1595_vm2, %v1570_v29 }
 0x16a   : > { %1601 = vst.msk [vmem:[%s2724_s5 + $0x28] sm:$0xff] %vm1595_vm2, %v1568_v42  ;;  %v2065_v50 = vpop.f32.mrb[56].mxu1  ;;  %v2142_v33 = vpop.f32.mrb[56].mxu0 }
 0x16b   : > { %v1477_v13 = vadd.f32 %v2142_v33, %v2693_v34  ;;  %v2066_v27 = vpop.f32.mrb[57].mxu1  ;;  %v1468_v31 = vpop.f32.mrb[57].mxu0 }
 0x16c   : > { %v2067_v38 = vadd.f32 %v2066_v27, %v2065_v50  ;;  %v1469_v20 = vadd.f32 %v1468_v31, %v2683_v5  ;;  %v2068_v39 = vpop.f32.mrb[58].mxu1  ;;  %v2143_v9 = vpop.f32.mrb[58].mxu0  ;;  %v1214_v27 = vadd.f32 %v2634_v0, %v2651_v40 }
 0x16d   : > { %v1573_v61 = vmax.f32 %v1477_v13, 0.0  ;;  %v1480_v34 = vadd.f32 %v2143_v9, %v2695_v35  ;;  %v2069_v41 = vpop.f32.mrb[59].mxu1  ;;  %v1471_v43 = vpop.f32.mrb[59].mxu0 }
 0x16e   : > { %v1571_v44 = vmax.f32 %v1469_v20, 0.0  ;;  %v2070_v25 = vadd.f32 %v2069_v41, %v2068_v39  ;;  %v1472_v45 = vadd.f32 %v1471_v43, %v2685_v11  ;;  %v2769_v47 = vadd.f32 %v2067_v38, %v1195_v48 }
 0x16f   : > { %1606 = vst.msk [vmem:[%s2724_s5 + $0x50] sm:$0xff] %vm1595_vm2, %v1573_v61  ;;  %v1574_v5 = vmax.f32 %v1480_v34, 0.0 }
 0x170   : > { %1604 = vst.msk [vmem:[%s2724_s5 + $0x40] sm:$0xff] %vm1595_vm2, %v1571_v44  ;;  %v1572_v53 = vmax.f32 %v1472_v45, 0.0  ;;  %v2775_v51 = vadd.f32 %v2070_v25, %v1198_v63 }
 0x171   : > { %1607 = vst.msk [vmem:[%s2724_s5 + $0x58] sm:$0xff] %vm1595_vm2, %v1574_v5 }
 0x172   : > { %1605 = vst.msk [vmem:[%s2724_s5 + $0x48] sm:$0xff] %vm1595_vm2, %v1572_v53  ;;  %v2071_v35 = vpop.f32.mrb[60].mxu1  ;;  %v2146_v56 = vpop.f32.mrb[60].mxu0  ;;  %v1222_v53 = vadd.f32 %v2638_v12, %v2651_v40 }
 0x173   : > { %v1493_v10 = vadd.f32 %v2146_v56, %v2713_v17  ;;  %v2072_v1 = vpop.f32.mrb[61].mxu1  ;;  %v1484_v11 = vpop.f32.mrb[61].mxu0 }
 0x174   : > { %v2073_v60 = vadd.f32 %v2072_v1, %v2071_v35  ;;  %v1485_v54 = vadd.f32 %v1484_v11, %v2703_v57  ;;  %v2074_v21 = vpop.f32.mrb[62].mxu1  ;;  %v2147_v62 = vpop.f32.mrb[62].mxu0 }
 0x175   : > { %v1577_v3 = vmax.f32 %v1493_v10, 0.0  ;;  %v1496_v17 = vadd.f32 %v2147_v62, %v2715_v19  ;;  %v2075_v37 = vpop.f32.mrb[63].mxu1  ;;  %v1487_v14 = vpop.f32.mrb[63].mxu0 }
 0x176   : > { %v1575_v28 = vmax.f32 %v1485_v54, 0.0  ;;  %v2076_v49 = vadd.f32 %v2075_v37, %v2074_v21  ;;  %v1488_v4 = vadd.f32 %v1487_v14, %v2705_v32  ;;  %v1364_v15 = vadd.f32 %v2073_v60, %v1203_v59 }
 0x177   : > { %1610 = vst.msk [vmem:[%s2724_s5 + $0x70] sm:$0xff] %vm1595_vm2, %v1577_v3  ;;  %v1578_v57 = vmax.f32 %v1496_v17, 0.0  ;;  %v1211_v32 = vadd.f32 %v2632_v58, %v2651_v40 }
 0x178   : > { %1608 = vst.msk [vmem:[%s2724_s5 + $0x60] sm:$0xff] %vm1595_vm2, %v1575_v28  ;;  %v1576_v16 = vmax.f32 %v1488_v4, 0.0  ;;  %v1367_v46 = vadd.f32 %v2076_v49, %v1206_v2  ;;  %v1230_v4 = vadd.f32 %v2642_v24, %v2651_v40 }
 0x179   : > { %1611 = vst.msk [vmem:[%s2724_s5 + $0x78] sm:$0xff] %vm1595_vm2, %v1578_v57 }
 0x17a   : > { %1609 = vst.msk [vmem:[%s2724_s5 + $0x68] sm:$0xff] %vm1595_vm2, %v1576_v16  ;;  %v2077_v8 = vpop.f32.mrb[64].mxu1  ;;  %v2150_v19 = vpop.f32.mrb[64].mxu0 }
 0x17b   : > { %v1509_v23 = vadd.f32 %v2150_v19, %v1348_v26  ;;  %v2078_v22 = vpop.f32.mrb[65].mxu1  ;;  %v1500_v29 = vpop.f32.mrb[65].mxu0 }
 0x17c   : > { %v2079_v42 = vadd.f32 %v2078_v22, %v2077_v8  ;;  %v1501_v50 = vadd.f32 %v1500_v29, %v2731_v7  ;;  %v2080_v33 = vpop.f32.mrb[66].mxu1  ;;  %v2151_v13 = vpop.f32.mrb[66].mxu0 }
 0x17d   : > { %v1581_v31 = vmax.f32 %v1509_v23, 0.0  ;;  %v1512_v26 = vadd.f32 %v2151_v13, %v2755_v52  ;;  %v2081_v48 = vpop.f32.mrb[67].mxu1  ;;  %v1503_v38 = vpop.f32.mrb[67].mxu0  ;;  %v1235_v13 = vadd.f32 %v2644_v30, %v2651_v40 }
 0x17e   : > { %v1579_v20 = vmax.f32 %v1501_v50, 0.0  ;;  %v2082_v39 = vadd.f32 %v2081_v48, %v2080_v33  ;;  %v1504_v58 = vadd.f32 %v1503_v38, %v2737_v55  ;;  %v1372_v9 = vadd.f32 %v2079_v42, %v1211_v32 }
 0x17f   : > { %1614 = vst.msk [vmem:[%s2724_s5 + $0x90] sm:$0xff] %vm1595_vm2, %v1581_v31  ;;  %v1582_v7 = vmax.f32 %v1512_v26, 0.0  ;;  %v1219_v55 = vadd.f32 %v2636_v6, %v2651_v40  ;;  %v1238_v38 = vadd.f32 %v2646_v36, %v2651_v40 }
 0x180   : > { %1612 = vst.msk [vmem:[%s2724_s5 + $0x80] sm:$0xff] %vm1595_vm2, %v1579_v20  ;;  %v1580_v63 = vmax.f32 %v1504_v58, 0.0  ;;  %v1375_v61 = vadd.f32 %v2082_v39, %v1214_v27 }
 0x181   : > { %1615 = vst.msk [vmem:[%s2724_s5 + $0x98] sm:$0xff] %vm1595_vm2, %v1582_v7 }
 0x182   : > { %1613 = vst.msk [vmem:[%s2724_s5 + $0x88] sm:$0xff] %vm1595_vm2, %v1580_v63  ;;  %v2083_v0 = vpop.f32.mrb[68].mxu1  ;;  %v2154_v52 = vpop.f32.mrb[68].mxu0 }
 0x183   : > { %v1525_v34 = vadd.f32 %v2154_v52, %v1364_v15  ;;  %v2084_v41 = vpop.f32.mrb[69].mxu1  ;;  %v1516_v43 = vpop.f32.mrb[69].mxu0 }
 0x184   : > { %v2085_v44 = vadd.f32 %v2084_v41, %v2083_v0  ;;  %v1517_v25 = vadd.f32 %v1516_v43, %v2769_v47  ;;  %v2086_v45 = vpop.f32.mrb[70].mxu1  ;;  %v2155_v5 = vpop.f32.mrb[70].mxu0 }
 0x185   : > { %v1585_v35 = vmax.f32 %v1525_v34, 0.0  ;;  %v1528_v56 = vadd.f32 %v2155_v5, %v1367_v46  ;;  %v2087_v10 = vpop.f32.mrb[71].mxu1  ;;  %v1519_v1 = vpop.f32.mrb[71].mxu0 }
 0x186   : > { %v1583_v11 = vmax.f32 %v1517_v25, 0.0  ;;  %v2088_v59 = vadd.f32 %v2087_v10, %v2086_v45  ;;  %v1520_v60 = vadd.f32 %v1519_v1, %v2775_v51  ;;  %v1380_v6 = vadd.f32 %v2085_v44, %v1219_v55 }
 0x187   : > { %1618 = vst.msk [vmem:[%s2724_s5 + $0xb0] sm:$0xff] %vm1595_vm2, %v1585_v35  ;;  %v1586_v54 = vmax.f32 %v1528_v56, 0.0  ;;  %v1227_v51 = vadd.f32 %v2640_v18, %v2651_v40 }
 0x188   : > { %1616 = vst.msk [vmem:[%s2724_s5 + $0xa0] sm:$0xff] %vm1595_vm2, %v1583_v11  ;;  %v1584_v47 = vmax.f32 %v1520_v60, 0.0  ;;  %v1383_v21 = vadd.f32 %v2088_v59, %v1222_v53 }
 0x189   : > { %1619 = vst.msk [vmem:[%s2724_s5 + $0xb8] sm:$0xff] %vm1595_vm2, %v1586_v54 }
 0x18a   : > { %1617 = vst.msk [vmem:[%s2724_s5 + $0xa8] sm:$0xff] %vm1595_vm2, %v1584_v47  ;;  %v2089_v12 = vpop.f32.mrb[72].mxu1  ;;  %v2158_v62 = vpop.f32.mrb[72].mxu0 }
 0x18b   : > { %v1541_v2 = vadd.f32 %v2158_v62, %v1380_v6  ;;  %v2090_v3 = vpop.f32.mrb[73].mxu1  ;;  %v1532_v17 = vpop.f32.mrb[73].mxu0 }
 0x18c   : > { %v2091_v37 = vadd.f32 %v2090_v3, %v2089_v12  ;;  %v1533_v14 = vadd.f32 %v1532_v17, %v1372_v9  ;;  %v2092_v28 = vpop.f32.mrb[74].mxu1  ;;  %v2159_v49 = vpop.f32.mrb[74].mxu0 }
 0x18d   : > { %v1589_v15 = vmax.f32 %v1541_v2, 0.0  ;;  %v1544_v57 = vadd.f32 %v2159_v49, %v1383_v21  ;;  %v2093_v16 = vpop.f32.mrb[75].mxu1  ;;  %v1535_v46 = vpop.f32.mrb[75].mxu0 }
 0x18e   : > { %v1587_v8 = vmax.f32 %v1533_v14, 0.0  ;;  %v2094_v19 = vadd.f32 %v2093_v16, %v2092_v28  ;;  %v1536_v23 = vadd.f32 %v1535_v46, %v1375_v61  ;;  %v1388_v22 = vadd.f32 %v2091_v37, %v1227_v51 }
 0x18f   : > { %1622 = vst.msk [vmem:[%s2724_s5 + $0xd0] sm:$0xff] %vm1595_vm2, %v1589_v15  ;;  %v1590_v18 = vmax.f32 %v1544_v57, 0.0 }
 0x190   : > { %1620 = vst.msk [vmem:[%s2724_s5 + $0xc0] sm:$0xff] %vm1595_vm2, %v1587_v8  ;;  %v1588_v29 = vmax.f32 %v1536_v23, 0.0  ;;  %v1391_v32 = vadd.f32 %v2094_v19, %v1230_v4 }
 0x191   : > { %1623 = vst.msk [vmem:[%s2724_s5 + $0xd8] sm:$0xff] %vm1595_vm2, %v1590_v18 }
 0x192   : > { %1621 = vst.msk [vmem:[%s2724_s5 + $0xc8] sm:$0xff] %vm1595_vm2, %v1588_v29  ;;  %v2095_v24 = vpop.f32.mrb[76].mxu1  ;;  %v2162_v42 = vpop.f32.mrb[76].mxu0 }
 0x193   : > { %v2096_v50 = vpop.f32.mrb[77].mxu1  ;;  %v1548_v33 = vpop.f32.mrb[77].mxu0 }
 0x194   : > { %v2097_v27 = vadd.f32 %v2096_v50, %v2095_v24  ;;  %v1549_v31 = vadd.f32 %v1548_v33, %v1388_v22  ;;  %v2098_v26 = vpop.f32.mrb[78].mxu1  ;;  %v2163_v48 = vpop.f32.mrb[78].mxu0 }
 0x195   : > { %v2099_v20 = vpop.f32.mrb[79].mxu1  ;;  %v1551_v39 = vpop.f32.mrb[79].mxu0 }
 0x196   : > { %v1396_v58 = vadd.f32 %v2097_v27, %v1235_v13  ;;  %v1591_v9 = vmax.f32 %v1549_v31, 0.0  ;;  %v2100_v7 = vadd.f32 %v2099_v20, %v2098_v26  ;;  %v1552_v63 = vadd.f32 %v1551_v39, %v1391_v32 }
 0x198   : > { %v1557_v61 = vadd.f32 %v2162_v42, %v1396_v58  ;;  %1624 = vst.msk [vmem:[%s2724_s5 + $0xe0] sm:$0xff] %vm1595_vm2, %v1591_v9  ;;  %v1399_v30 = vadd.f32 %v2100_v7, %v1238_v38  ;;  %v1592_v0 = vmax.f32 %v1552_v63, 0.0 }
 0x19a   : > { %v1593_v52 = vmax.f32 %v1557_v61, 0.0  ;;  %v1560_v34 = vadd.f32 %v2163_v48, %v1399_v30  ;;  %1625 = vst.msk [vmem:[%s2724_s5 + $0xe8] sm:$0xff] %vm1595_vm2, %v1592_v0 }
 0x19c   : > { %1626 = vst.msk [vmem:[%s2724_s5 + $0xf0] sm:$0xff] %vm1595_vm2, %v1593_v52  ;;  %v1594_v41 = vmax.f32 %v1560_v34, 0.0 }
 0x19e   : > { %1627 = vst.msk [vmem:[%s2724_s5 + $0xf8] sm:$0xff] %vm1595_vm2, %v1594_v41 }
 0x19f PF: > { %s13_s14 = sadd.s32 1, %s2377_s14   ;;  %s2863_s12 = smov %s2373_s13 }
 0x1a0   : > { %p10_p5 = scmp.ge.s32.totalorder %s13_s14, 4   ;;  %s2864_s13 = smov %s2866_s15 }
 0x1a2   :  { %12 = sbr.rel (!%p10_p5) target bundleno = 2 (0x2), region = 68 }

</bundles_post_ra>
